<compile_context>
chip_gen: v5e
topology: v5e:2x2
jax: 0.10.0
libtpu: 0.0.40
codegen_flags: <defaults>
</compile_context>

<pallas_src>
import functools

import jax
import jax.numpy as jnp
from jax.experimental import pallas as pl
from jax.experimental.pallas import tpu as pltpu


def _mlp_kernel(x_ref, w1_ref, b1_ref, w2_ref, b2_ref, w3_ref, b3_ref, o_ref,
                *, use_bf16_mxu: bool):
    """Fused MLP, batch on the lane axis.

    x_ref : (1, tile_B)   activations, batch lane-dense
    w1_ref: (16, 1)   b1_ref: (16, 1)
    w2_ref: (16, 16)  b2_ref: (16, 1)
    w3_ref: (16, 1)   b3_ref: (1, 1)
    o_ref : (1, tile_B)
    """
    x = x_ref[...]                                                   # (1, tile_B)

    # fc1 (in_features = 1): degenerate K=1 matmul -> pure-VPU broadcast FMA.
    h1 = jnp.maximum(w1_ref[...] * x + b1_ref[...], 0.0)            # (16, tile_B)

    # fc2 (16x16): the only real MXU matmul, batch on the N dimension.
    w2 = w2_ref[...]
    if use_bf16_mxu:
        h2 = jnp.dot(w2.astype(jnp.bfloat16), h1.astype(jnp.bfloat16),
                     preferred_element_type=jnp.float32)
    else:
        h2 = jnp.dot(w2, h1, preferred_element_type=jnp.float32)
    h2 = jnp.maximum(h2 + b2_ref[...], 0.0)                          # (16, tile_B)

    # fc_out (out_features = 1): degenerate N=1 matmul -> VPU mul + sublane reduce.
    logits = jnp.sum(w3_ref[...] * h2, axis=0, keepdims=True) + b3_ref[...]  # (1, tile_B)

    # sigmoid(z) == 0.5 * tanh(0.5 * z) + 0.5  (single EUP op, exact identity)
    o_ref[...] = 0.5 * jnp.tanh(0.5 * logits) + 0.5


def prediction_network_forward(x, params, *, tile_b=None, use_bf16_mxu=None):
    """x: (B, 1) float32. params: PyTorch-layout weights (w*: (out, in), b*: (out,)).

    Returns sigmoid(fc_out(relu(fc2(relu(fc1(x)))))) with shape (B, 1).
    """
    B = x.shape[0]

    if use_bf16_mxu is None:
        # bf16 on the middle matmul only pays off (and only matters) at large B.
        use_bf16_mxu = B >= 4096
    if tile_b is None:
        # Full-extent block for small B; 32768-wide lane tiles for large B
        # (~<8 MiB per step incl. (16, tile_B) f32 intermediates -> v7x-safe).
        tile_b = B if B <= 32768 else 32768

    # Layout change: batch on the lane (last) axis, features on sublanes.
    x_t = x.reshape(1, B)                        # (1, B)
    w1 = params["w1"].reshape(16, 1)             # (16, 1)  column
    b1 = params["b1"].reshape(16, 1)
    w2 = params["w2"]                            # (16, 16) (out, in) -> w2 @ h1
    b2 = params["b2"].reshape(16, 1)
    w3 = params["w3"].reshape(16, 1)             # (1, 16) -> column
    b3 = params["b3"].reshape(1, 1)

    grid = (pl.cdiv(B, tile_b),)

    def full(shape):
        return pl.BlockSpec(shape, lambda i: (0, 0))

    out = pl.pallas_call(
        functools.partial(_mlp_kernel, use_bf16_mxu=use_bf16_mxu),
        out_shape=jax.ShapeDtypeStruct((1, B), jnp.float32),
        grid_spec=pltpu.PrefetchScalarGridSpec(
            num_scalar_prefetch=0,
            grid=grid,
            in_specs=[
                pl.BlockSpec((1, tile_b), lambda i: (0, i)),   # x   (lane-dense tiles)
                full((16, 1)), full((16, 1)),                  # w1, b1
                full((16, 16)), full((16, 1)),                 # w2, b2
                full((16, 1)), full((1, 1)),                   # w3, b3
            ],
            out_specs=pl.BlockSpec((1, tile_b), lambda i: (0, i)),
        ),
        compiler_params=pltpu.CompilerParams(
            dimension_semantics=("parallel",)),                # megacore split on v7x
    )(x_t, w1, b1, w2, b2, w3, b3)

    return out.reshape(B, 1)


def init_params(key):
    """PyTorch nn.Linear default init: U(-1/sqrt(fan_in), +1/sqrt(fan_in)),
    weights stored (out_features, in_features), biases (out_features,)."""
    def linear(k, fan_in, fan_out):
        kw, kb = jax.random.split(k)
        bound = 1.0 / jnp.sqrt(float(fan_in))
        w = jax.random.uniform(kw, (fan_out, fan_in), jnp.float32, -bound, bound)
        b = jax.random.uniform(kb, (fan_out,), jnp.float32, -bound, bound)
        return w, b

    k1, k2, k3 = jax.random.split(key, 3)
    w1, b1 = linear(k1, 1, 16)
    w2, b2 = linear(k2, 16, 16)
    w3, b3 = linear(k3, 16, 1)
    return {"w1": w1, "b1": b1, "w2": w2, "b2": b2, "w3": w3, "b3": b3}


def reference_forward(x, p):
    """Plain-JAX mirror of the PyTorch forward (x @ W.T + b)."""
    h1 = jnp.maximum(x @ p["w1"].T + p["b1"], 0.0)
    h2 = jnp.maximum(h1 @ p["w2"].T + p["b2"], 0.0)
    return jax.nn.sigmoid(h2 @ p["w3"].T + p["b3"])


if __name__ == "__main__":
    key = jax.random.PRNGKey(0)
    kp, kx = jax.random.split(key)
    params = init_params(kp)

    # Small shape implied by the module: (batch, 1)
    B = 8
    x = jax.random.normal(kx, (B, 1), jnp.float32)

    out = jax.block_until_ready(prediction_network_forward(x, params))
    ref = reference_forward(x, params)
    assert out.shape == (B, 1)
    assert jnp.allclose(out, ref, atol=1e-5, rtol=1e-5), (out, ref)

    # Exercise the gridded (large-B) path: lane-dense 128-wide tiles, 4 grid steps, f32 MXU.
    B2 = 512
    x2 = jax.random.normal(kx, (B2, 1), jnp.float32)
    out2 = jax.block_until_ready(
        prediction_network_forward(x2, params, tile_b=128, use_bf16_mxu=False))
    ref2 = reference_forward(x2, params)
    assert out2.shape == (B2, 1)
    assert jnp.allclose(out2, ref2, atol=1e-5, rtol=1e-5)

    # Exercise the bf16 middle-matmul path (large-B mode); looser tolerance per review note.
    out3 = jax.block_until_ready(
        prediction_network_forward(x2, params, tile_b=128, use_bf16_mxu=True))
    assert jnp.allclose(out3, ref2, atol=2e-2, rtol=0.0)

    print("KERNEL_OK")
</pallas_src>

<mosaic_0001>
module attributes {stable_mosaic.version = 11 : i64} {
  func.func @_mlp_kernel(%arg0: i32, %arg1: memref<1x8xf32, #tpu.memory_space<vmem>>, %arg2: memref<16x1xf32, #tpu.memory_space<vmem>>, %arg3: memref<16x1xf32, #tpu.memory_space<vmem>>, %arg4: memref<16x16xf32, #tpu.memory_space<vmem>>, %arg5: memref<16x1xf32, #tpu.memory_space<vmem>>, %arg6: memref<16x1xf32, #tpu.memory_space<vmem>>, %arg7: memref<1x1xf32, #tpu.memory_space<vmem>>, %arg8: memref<1x8xf32, #tpu.memory_space<vmem>>) attributes {dimension_semantics = [#tpu.dimension_semantics<parallel>], iteration_bounds = array<i64: 1>, scalar_prefetch = 0 : i64, scratch_operands = 0 : i64, tpu.core_type = #tpu.core_type<tc>, window_params = [{transform_indices = @transform_0, window_bounds = array<i64: 1, 8>}, {pipeline_mode = #tpu.pipeline_mode<synchronous>, transform_indices = @transform_1, window_bounds = array<i64: 16, 1>}, {pipeline_mode = #tpu.pipeline_mode<synchronous>, transform_indices = @transform_2, window_bounds = array<i64: 16, 1>}, {pipeline_mode = #tpu.pipeline_mode<synchronous>, transform_indices = @transform_3, window_bounds = array<i64: 16, 16>}, {pipeline_mode = #tpu.pipeline_mode<synchronous>, transform_indices = @transform_4, window_bounds = array<i64: 16, 1>}, {pipeline_mode = #tpu.pipeline_mode<synchronous>, transform_indices = @transform_5, window_bounds = array<i64: 16, 1>}, {pipeline_mode = #tpu.pipeline_mode<synchronous>, transform_indices = @transform_6, window_bounds = array<i64: 1, 1>}, {transform_indices = @transform_7, window_bounds = array<i64: 1, 8>}]} {
    %c0 = arith.constant 0 : index
    %c0_0 = arith.constant 0 : index
    %0 = vector.load %arg1[%c0, %c0_0] : memref<1x8xf32, #tpu.memory_space<vmem>>, vector<1x8xf32>
    %c0_1 = arith.constant 0 : index
    %c0_2 = arith.constant 0 : index
    %1 = vector.load %arg2[%c0_1, %c0_2] : memref<16x1xf32, #tpu.memory_space<vmem>>, vector<16x1xf32>
    %2 = vector.broadcast %1 : vector<16x1xf32> to vector<16x8xf32>
    %3 = vector.broadcast %0 : vector<1x8xf32> to vector<16x8xf32>
    %4 = arith.mulf %2, %3 : vector<16x8xf32>
    %c0_3 = arith.constant 0 : index
    %c0_4 = arith.constant 0 : index
    %5 = vector.load %arg3[%c0_3, %c0_4] : memref<16x1xf32, #tpu.memory_space<vmem>>, vector<16x1xf32>
    %6 = vector.broadcast %5 : vector<16x1xf32> to vector<16x8xf32>
    %7 = arith.addf %4, %6 : vector<16x8xf32>
    %cst = arith.constant 0.000000e+00 : f32
    %8 = vector.broadcast %cst : f32 to vector<16x8xf32>
    %9 = arith.maximumf %7, %8 : vector<16x8xf32>
    %c0_5 = arith.constant 0 : index
    %c0_6 = arith.constant 0 : index
    %10 = vector.load %arg4[%c0_5, %c0_6] : memref<16x16xf32, #tpu.memory_space<vmem>>, vector<16x16xf32>
    %cst_7 = arith.constant dense<0.000000e+00> : vector<16x8xf32>
    %11 = tpu.matmul %10, %9, %cst_7 {dimension_numbers = #tpu.dot_dimension_numbers<[1], [0], [0], [1], [0, 0, 1, 1], [], []>} : vector<16x16xf32>, vector<16x8xf32>, vector<16x8xf32> -> vector<16x8xf32>
    %c0_8 = arith.constant 0 : index
    %c0_9 = arith.constant 0 : index
    %12 = vector.load %arg5[%c0_8, %c0_9] : memref<16x1xf32, #tpu.memory_space<vmem>>, vector<16x1xf32>
    %13 = vector.broadcast %12 : vector<16x1xf32> to vector<16x8xf32>
    %14 = arith.addf %11, %13 : vector<16x8xf32>
    %cst_10 = arith.constant 0.000000e+00 : f32
    %15 = vector.broadcast %cst_10 : f32 to vector<16x8xf32>
    %16 = arith.maximumf %14, %15 : vector<16x8xf32>
    %c0_11 = arith.constant 0 : index
    %c0_12 = arith.constant 0 : index
    %17 = vector.load %arg6[%c0_11, %c0_12] : memref<16x1xf32, #tpu.memory_space<vmem>>, vector<16x1xf32>
    %18 = vector.broadcast %17 : vector<16x1xf32> to vector<16x8xf32>
    %19 = arith.mulf %18, %16 : vector<16x8xf32>
    %cst_13 = arith.constant dense<0.000000e+00> : vector<8xf32>
    %20 = vector.multi_reduction <add>, %19, %cst_13 [0] : vector<16x8xf32> to vector<8xf32>
    %21 = vector.shape_cast %20 : vector<8xf32> to vector<1x8xf32>
    %c0_14 = arith.constant 0 : index
    %c0_15 = arith.constant 0 : index
    %22 = vector.load %arg7[%c0_14, %c0_15] : memref<1x1xf32, #tpu.memory_space<vmem>>, vector<1x1xf32>
    %23 = vector.broadcast %22 : vector<1x1xf32> to vector<1x8xf32>
    %24 = arith.addf %21, %23 : vector<1x8xf32>
    %cst_16 = arith.constant 5.000000e-01 : f32
    %25 = vector.broadcast %cst_16 : f32 to vector<1x8xf32>
    %26 = arith.mulf %25, %24 : vector<1x8xf32>
    %27 = math.tanh %26 : vector<1x8xf32>
    %cst_17 = arith.constant 5.000000e-01 : f32
    %28 = vector.broadcast %cst_17 : f32 to vector<1x8xf32>
    %29 = arith.mulf %28, %27 : vector<1x8xf32>
    %cst_18 = arith.constant 5.000000e-01 : f32
    %30 = vector.broadcast %cst_18 : f32 to vector<1x8xf32>
    %31 = arith.addf %29, %30 : vector<1x8xf32>
    %c0_19 = arith.constant 0 : index
    %c0_20 = arith.constant 0 : index
    %32 = vector.load %arg8[%c0_19, %c0_20] : memref<1x8xf32, #tpu.memory_space<vmem>>, vector<1x8xf32>
    tpu.vector_store %arg8[%c0_19, %c0_20], %31 {strides = array<i32>} : memref<1x8xf32, #tpu.memory_space<vmem>>, vector<1x8xf32>,
    return
  }
  func.func @transform_0(%arg0: i32) -> (i32, i32) {
    %c0_i32 = arith.constant 0 : i32
    %c0_i32_0 = arith.constant 0 : i32
    return %c0_i32, %arg0 : i32, i32
  }
  func.func @transform_1(%arg0: i32) -> (i32, i32) {
    %c0_i32 = arith.constant 0 : i32
    %c0_i32_0 = arith.constant 0 : i32
    %c0_i32_1 = arith.constant 0 : i32
    return %c0_i32, %c0_i32_0 : i32, i32
  }
  func.func @transform_2(%arg0: i32) -> (i32, i32) {
    %c0_i32 = arith.constant 0 : i32
    %c0_i32_0 = arith.constant 0 : i32
    %c0_i32_1 = arith.constant 0 : i32
    return %c0_i32, %c0_i32_0 : i32, i32
  }
  func.func @transform_3(%arg0: i32) -> (i32, i32) {
    %c0_i32 = arith.constant 0 : i32
    %c0_i32_0 = arith.constant 0 : i32
    %c0_i32_1 = arith.constant 0 : i32
    return %c0_i32, %c0_i32_0 : i32, i32
  }
  func.func @transform_4(%arg0: i32) -> (i32, i32) {
    %c0_i32 = arith.constant 0 : i32
    %c0_i32_0 = arith.constant 0 : i32
    %c0_i32_1 = arith.constant 0 : i32
    return %c0_i32, %c0_i32_0 : i32, i32
  }
  func.func @transform_5(%arg0: i32) -> (i32, i32) {
    %c0_i32 = arith.constant 0 : i32
    %c0_i32_0 = arith.constant 0 : i32
    %c0_i32_1 = arith.constant 0 : i32
    return %c0_i32, %c0_i32_0 : i32, i32
  }
  func.func @transform_6(%arg0: i32) -> (i32, i32) {
    %c0_i32 = arith.constant 0 : i32
    %c0_i32_0 = arith.constant 0 : i32
    %c0_i32_1 = arith.constant 0 : i32
    return %c0_i32, %c0_i32_0 : i32, i32
  }
  func.func @transform_7(%arg0: i32) -> (i32, i32) {
    %c0_i32 = arith.constant 0 : i32
    %c0_i32_0 = arith.constant 0 : i32
    return %c0_i32, %arg0 : i32, i32
  }
}

</mosaic_0001>

<bundles_post_ra>
// kernel: tpu_custom_call.1
= control target key start
LH: loop header
LB: loop body
LE: loop exit
PB: predicated region body
PF: predicated region fallthrough
CT: control target
= control target key end

     0   :  { %s282_s0 = inlined_call_operand.vmem [shape: f32[1,8], index: 0, kind: input, shape index: {}]   ;;  %s283_s1 = inlined_call_operand.vmem [shape: f32[16,1], index: 1, kind: input, shape index: {}]   ;;  %s284_s2 = inlined_call_operand.vmem [shape: f32[16,1], index: 2, kind: input, shape index: {}]   ;;  %s285_s3 = inlined_call_operand.vmem [shape: f32[16,16], index: 3, kind: input, shape index: {}]   ;;  %s286_s4 = inlined_call_operand.vmem [shape: f32[16,1], index: 4, kind: input, shape index: {}]   ;;  %s287_s5 = inlined_call_operand.vmem [shape: f32[16,1], index: 5, kind: input, shape index: {}]   ;;  %s288_s6 = inlined_call_operand.<no memory space> [shape: f32[1,1], index: 6, kind: input, shape index: {}]   ;;  %s289_s7 = inlined_call_operand.hbm [shape: f32[1,8], index: 7, kind: output, shape index: {}]  }
   0x1   :  { %v12_v0 = vstv %s288_s6 }
   0x2   :  { %13 = vst [vmem:[#allocation2] sm:$0x1] %v12_v0 }
   0x3   :  { %v48_v1 = vld [vmem:[%s284_s2 + $0x8] sm:$0xff]  ;;  %v201_v3 = vmov 0  }
   0x4   :  { %v31_v2 = vld [vmem:[%s283_s1 + $0x8] sm:$0xff]  ;;  %170 = vset.pattern.permute.xlu1 %v201_v3  ;;  %169 = vset.pattern.permute.xlu0 %v201_v3 }
   0x5   :  { %56 = vperm.xlu1 %170, %v48_v1   ;;  %39 = vperm.xlu0 %169, %v31_v2  }
   0x6   :  { %14 = vsyncpa [#allocation4], 0  ;;  %171 = vset.pattern.permute.xlu2 %v201_v3  ;;  %v47_v4 = vld [vmem:[%s284_s2] sm:$0xff]  ;;  %v110_v6 = vld [vmem:[%s287_s5 + $0x8] sm:$0xff]  ;;  %vm77_vm0 = vcmask 130048   ;;  %vm123_vm1 = vcmask 64512  }
   0x7   :  { %v30_v5 = vld [vmem:[%s283_s1] sm:$0xff]  ;;  %v66_v9 = vld [vmem:[%s286_s4 + $0x8] sm:$0xff]  ;;  %s154_s22 = sshll.u32 %s289_s7, 4  ;;  %vm145_vm2 = vcmask 57344   ;;  %s155_s22 = int_to_ptr.hbm [resolvable:$true] %s154_s22 }
   0x8   :  { %v109_v7 = vld [vmem:[%s287_s5] sm:$0xff]  ;;  %v64_v23 = vld [vmem:[%s285_s3 + $0x8] sm:$0xff] }
   0x9   :  { %v65_v8 = vld [vmem:[%s286_s4] sm:$0xff] }
   0xa   :  { %69 = vperm.xlu2 %171, %v65_v8   ;;  %v172_v10 = vld [vmem:[%s282_s0] ss:$0 sm:$0xff] }
   0xb   :  { %v133_v11 = vld [vmem:[#allocation2] sm:$0x1] }
   0xc   :  { %v63_v22 = vld [vmem:[%s285_s3] sm:$0xff]  ;;  %s202_s3 = smov [#allocation3]  }
   0xd   :  { %51 = vperm.xlu1 %170, %v47_v4   ;;  %34 = vperm.xlu0 %169, %v30_v5   ;;  %s152_s19 = sshll.u32 %s202_s3, 4  ;;  %s153_s19 = int_to_ptr.vmem [resolvable:$true] %s152_s19 }
  0x12   :  { %74 = vperm.xlu2 %171, %v66_v9  }
  0x15   :  { %118 = vperm.xlu1 %170, %v110_v6   ;;  %113 = vperm.xlu0 %169, %v109_v7  }
  0x1a   :  { %136 = vperm.xlu2 %171, %v133_v11  }
  0x64   :  { %v70_v24 = vpop.permute.xlu2 %69 }
  0x6c   :  { %v75_v25 = vpop.permute.xlu2 %74 }
  0x74   :  { %v137_v43 = vpop.permute.xlu2 %136 }
  0x75   :  { %v139_v45 = vperm.slane %v137_v43, 0 }
  0x77   :  { %v57_v12 = vpop.permute.xlu1 %56  ;;  %v40_v13 = vpop.permute.xlu0 %39 }
  0x78   :  { %v46_v14 = vmul.f32 %v172_v10, %v40_v13 }
  0x7a   :  { %v60_v15 = vadd.f32 %v57_v12, %v46_v14 }
  0x7c   :  { %v62_v16 = vmax.f32 %v60_v15, 0.0 }
  0x7e   :  { %98 = vmatpush.msra.mxu0 %v62_v16  ;;  %165 = vmatpush.msra.mxu1 %v62_v16 }
  0x7f   :  { %v35_v17 = vpop.permute.xlu0 %34  ;;  %v52_v19 = vpop.permute.xlu1 %51 }
  0x80   :  { %v45_v18 = vmul.f32 %v172_v10, %v35_v17 }
  0x82   :  { %v59_v20 = vadd.f32 %v52_v19, %v45_v18 }
  0x84   :  { %v61_v21 = vmax.f32 %v59_v20, 0.0 }
  0x86   :  { %99 = vmatpush.msra.mxu0 %v61_v21  ;;  %166 = vmatpush.msra.mxu1 %v61_v21 }
  0x87   :  { %163 = vmatmul.msk.f32.vlgmr.msra.gmra.mxu0 %vm77_vm0, %v63_v22  ;;  %164 = vmatmul.msk.f32.vlgmr.msra.gmra.mxu1 %vm77_vm0, %v64_v23  ;;  %v119_v32 = vpop.permute.xlu1 %118  ;;  %v114_v33 = vpop.permute.xlu0 %113 }
 0x104   :  { %v101_v26 = vpop.f32.mrf.mxu0  ;;  %v104_v27 = vpop.f32.mrf.mxu1 }
 0x105   :  { %v102_v28 = vadd.f32 %v101_v26, %v70_v24  ;;  %v105_v29 = vadd.f32 %v104_v27, %v75_v25 }
 0x107   :  { %v107_v30 = vmax.f32 %v102_v28, 0.0  ;;  %v108_v31 = vmax.f32 %v105_v29, 0.0 }
 0x109   :  { %v121_v34 = vmul.f32 %v114_v33, %v107_v30  ;;  %v122_v35 = vmul.f32 %v119_v32, %v108_v31 }
 0x10b   :  { %v124_v36 = vsel %vm123_vm1, %v121_v34, 0.0  ;;  %v125_v37 = vsel %vm123_vm1, %v122_v35, 0.0 }
 0x10c   :  { %v126_v38 = vadd.f32 %v125_v37, %v124_v36 }
 0x10e   :  { %v127_v39 = vrot.slane %v126_v38, 4 }
 0x110   :  { %v128_v40 = vadd.f32 %v127_v39, %v126_v38 }
 0x112   :  { %v129_v41 = vrot.slane %v128_v40, 2 }
 0x114   :  { %v130_v42 = vadd.f32 %v129_v41, %v128_v40 }
 0x116   :  { %v131_v44 = vrot.slane %v130_v42, 1 }
 0x118   :  { %v132_v46 = vadd.f32 %v131_v44, %v130_v42 }
 0x11a   :  { %v140_v47 = vadd.f32 %v139_v45, %v132_v46 }
 0x11c   :  { %v141_v48 = vmul.f32 0.5, %v140_v47 }
 0x11e   :  { %173 = vtanh.f32 %v141_v48 }
 0x124   :  { %v174_v49 = vpop.eup %173 }
 0x125   :  { %v143_v50 = vmul.f32 0.5, %v174_v49 }
 0x127   :  { %v144_v51 = vadd.f32 0.5, %v143_v50 }
 0x129   :  { %146 = vst.msk [vmem:[#allocation3] sm:$0x1] %vm145_vm2, %v144_v51 }
 0x12a   :  { %157 = dma.vmem_to_hbm [thread:$0]  %s153_s19, 16, %s155_s22, [#allocation4]  }
 0x12b   :  { %199 = dma.done.wait [#allocation4], 16  }
 0x12c   :  { %200 = vsyncadd [#allocation4], 4294967280 }
 0x12d   :  { %162 = vsyncpa [#allocation4], 1 }

</bundles_post_ra>
